<compile_context>
chip_gen: v7x
topology: tpu7x:2x2x1
jax: 0.10.0
libtpu: 0.0.40
codegen_flags: <defaults>
</compile_context>

<pallas_src>
import jax
import jax.numpy as jnp
from jax.experimental import pallas as pl
from jax.experimental.pallas import tpu as pltpu


def _round_up(n, m):
    return ((n + m - 1) // m) * m


def policy_mlp_kernel(x_ref, w1_ref, b1_ref, w2_ref, b2_ref, w3_ref, b3_ref, o_ref):
    """Fused relu(x@W1+b1) -> relu(@W2+b2) -> softmax(@W3+b3) over one batch tile."""
    wdt = w1_ref.dtype                       # f32 or bf16 weights; f32 accumulate
    x = x_ref[...].astype(wdt)

    # fc1 + ReLU (MXU matmul, f32 accumulate)
    h1 = jnp.dot(x, w1_ref[...], preferred_element_type=jnp.float32)
    h1 = jnp.maximum(h1 + b1_ref[...].astype(jnp.float32), 0.0)

    # fc2 + ReLU
    h2 = jnp.dot(h1.astype(wdt), w2_ref[...], preferred_element_type=jnp.float32)
    h2 = jnp.maximum(h2 + b2_ref[...].astype(jnp.float32), 0.0)

    # fc3 -- only action_dim columns, no lane padding / masking needed.
    logits = jnp.dot(h2.astype(wdt), w3_ref[...], preferred_element_type=jnp.float32)
    logits = logits + b3_ref[...].astype(jnp.float32)

    # Numerically-stable softmax along the last axis.
    m = jnp.max(logits, axis=-1, keepdims=True)
    e = jnp.exp(logits - m)
    denom = jnp.sum(e, axis=-1, keepdims=True)
    r = pl.reciprocal(denom, approx=True)     # EUP slot (near-free)
    r = r * (2.0 - denom * r)                 # one Newton step -> f32 accuracy
    o_ref[...] = (e * r).astype(o_ref.dtype)


def policy_network_forward(x, params, *, batch_tile=2048):
    """x: (B, state_dim).  params: (in,out) weights and (1,out) biases."""
    w1, b1, w2, b2, w3, b3 = (params["w1"], params["b1"], params["w2"],
                              params["b2"], params["w3"], params["b3"])
    B, state_dim = x.shape
    hidden = w1.shape[1]
    action_dim = w3.shape[1]

    # Batch tile: multiple of 8; for B >= 16 cap at ~half the batch so there
    # are >= 2 grid steps and v7x's two TensorCores both get a share.
    b8 = _round_up(B, 8)
    half = _round_up(pl.cdiv(b8, 2), 8) if b8 >= 16 else b8
    tb = max(8, min(batch_tile, half))
    grid = (pl.cdiv(B, tb),)

    def batch_spec(shape):       # tiled along batch
        return pl.BlockSpec(shape, lambda i: (i, 0))

    def resident(shape):         # same block every step -> stays in VMEM
        return pl.BlockSpec(shape, lambda i: (0, 0))

    # f32 VMEM budget: double-buffered x/out tiles + h1/h2/logits intermediates
    # + (double-buffered) weights; 2x headroom, clamped to <=32 MiB (v7x-safe).
    wbytes = jnp.dtype(w1.dtype).itemsize
    weight_elems = (state_dim * hidden + hidden * hidden + hidden * action_dim
                    + 2 * hidden + action_dim)
    vmem_bytes = (4 * (2 * tb * state_dim + 2 * tb * action_dim + 3 * tb * hidden)
                  + 2 * wbytes * weight_elems)
    vmem_limit = min(max(2 * vmem_bytes, 4 << 20), 32 << 20)

    return pl.pallas_call(
        policy_mlp_kernel,
        out_shape=jax.ShapeDtypeStruct((B, action_dim), x.dtype),
        grid=grid,
        in_specs=[
            batch_spec((tb, state_dim)),
            resident((state_dim, hidden)),
            resident((1, hidden)),
            resident((hidden, hidden)),
            resident((1, hidden)),
            resident((hidden, action_dim)),
            resident((1, action_dim)),
        ],
        out_specs=batch_spec((tb, action_dim)),
        compiler_params=pltpu.CompilerParams(
            dimension_semantics=("parallel",),
            vmem_limit_bytes=vmem_limit,
        ),
    )(x, w1, b1, w2, b2, w3, b3)


def init_params(key, state_dim, action_dim, hidden=128, dtype=jnp.float32):
    """Deterministic synthetic init (PyTorch-like uniform fan-in scaling)."""
    ks = jax.random.split(key, 6)

    def lin(kw, kb, fan_in, fan_out):
        bound = 1.0 / jnp.sqrt(fan_in)
        w = jax.random.uniform(kw, (fan_in, fan_out), jnp.float32, -bound, bound)
        b = jax.random.uniform(kb, (1, fan_out), jnp.float32, -bound, bound)
        return w.astype(dtype), b.astype(dtype)

    w1, b1 = lin(ks[0], ks[1], state_dim, hidden)
    w2, b2 = lin(ks[2], ks[3], hidden, hidden)
    w3, b3 = lin(ks[4], ks[5], hidden, action_dim)
    return {"w1": w1, "b1": b1, "w2": w2, "b2": b2, "w3": w3, "b3": b3}


def reference_forward(x, p):
    f32 = lambda a: a.astype(jnp.float32)
    h1 = jnp.maximum(x @ f32(p["w1"]) + f32(p["b1"]), 0.0)
    h2 = jnp.maximum(h1 @ f32(p["w2"]) + f32(p["b2"]), 0.0)
    return jax.nn.softmax(h2 @ f32(p["w3"]) + f32(p["b3"]), axis=-1)


if __name__ == "__main__":
    key = jax.random.PRNGKey(0)
    k_x, k_x2, k_p = jax.random.split(key, 3)

    B, state_dim, action_dim = 8, 32, 8
    params = init_params(k_p, state_dim, action_dim)

    # Case 1: tiny batch (single grid step), exact f32 parity.
    x = jax.random.normal(k_x, (B, state_dim), jnp.float32)
    out = jax.block_until_ready(policy_network_forward(x, params))
    ref = reference_forward(x, params)
    assert out.shape == (B, action_dim)
    assert jnp.allclose(jnp.sum(out, axis=-1), 1.0, atol=1e-5)
    assert jnp.allclose(out, ref, atol=1e-5, rtol=1e-5)

    # Case 2: ragged batch, multi-step grid -> exercises the partial-last-block
    # path (no wrapper-side padding of x, no output slice copy).
    B2 = 200
    x2 = jax.random.normal(k_x2, (B2, state_dim), jnp.float32)
    out2 = jax.block_until_ready(policy_network_forward(x2, params, batch_tile=64))
    ref2 = reference_forward(x2, params)
    assert out2.shape == (B2, action_dim)
    assert jnp.allclose(jnp.sum(out2, axis=-1), 1.0, atol=1e-5)
    assert jnp.allclose(out2, ref2, atol=1e-5, rtol=1e-5)

    # Case 3: bf16 weights (f32 MXU accumulation) -- halves weight DMA/VMEM.
    params_bf16 = init_params(k_p, state_dim, action_dim, dtype=jnp.bfloat16)
    out3 = jax.block_until_ready(policy_network_forward(x2, params_bf16))
    ref3 = reference_forward(x2, params_bf16)
    assert out3.shape == (B2, action_dim)
    assert jnp.allclose(jnp.sum(out3, axis=-1), 1.0, atol=1e-2)
    assert jnp.allclose(out3, ref3, atol=5e-2)

    print("KERNEL_OK")
</pallas_src>

<mosaic_0001>
module attributes {stable_mosaic.version = 11 : i64} {
  func.func @policy_mlp_kernel(%arg0: i32, %arg1: memref<8x32xf32, #tpu.memory_space<vmem>>, %arg2: memref<32x128xf32, #tpu.memory_space<vmem>>, %arg3: memref<1x128xf32, #tpu.memory_space<vmem>>, %arg4: memref<128x128xf32, #tpu.memory_space<vmem>>, %arg5: memref<1x128xf32, #tpu.memory_space<vmem>>, %arg6: memref<128x8xf32, #tpu.memory_space<vmem>>, %arg7: memref<1x8xf32, #tpu.memory_space<vmem>>, %arg8: memref<8x8xf32, #tpu.memory_space<vmem>>) attributes {dimension_semantics = [#tpu.dimension_semantics<parallel>], iteration_bounds = array<i64: 1>, scalar_prefetch = 0 : i64, scratch_operands = 0 : i64, tpu.core_type = #tpu.core_type<tc>, window_params = [{transform_indices = @transform_0, window_bounds = array<i64: 8, 32>}, {pipeline_mode = #tpu.pipeline_mode<synchronous>, transform_indices = @transform_1, window_bounds = array<i64: 32, 128>}, {pipeline_mode = #tpu.pipeline_mode<synchronous>, transform_indices = @transform_2, window_bounds = array<i64: 1, 128>}, {pipeline_mode = #tpu.pipeline_mode<synchronous>, transform_indices = @transform_3, window_bounds = array<i64: 128, 128>}, {pipeline_mode = #tpu.pipeline_mode<synchronous>, transform_indices = @transform_4, window_bounds = array<i64: 1, 128>}, {pipeline_mode = #tpu.pipeline_mode<synchronous>, transform_indices = @transform_5, window_bounds = array<i64: 128, 8>}, {pipeline_mode = #tpu.pipeline_mode<synchronous>, transform_indices = @transform_6, window_bounds = array<i64: 1, 8>}, {transform_indices = @transform_7, window_bounds = array<i64: 8, 8>}]} {
    %c0 = arith.constant 0 : index
    %c0_0 = arith.constant 0 : index
    %0 = vector.load %arg1[%c0, %c0_0] : memref<8x32xf32, #tpu.memory_space<vmem>>, vector<8x32xf32>
    %c0_1 = arith.constant 0 : index
    %c0_2 = arith.constant 0 : index
    %1 = vector.load %arg2[%c0_1, %c0_2] : memref<32x128xf32, #tpu.memory_space<vmem>>, vector<32x128xf32>
    %cst = arith.constant dense<0.000000e+00> : vector<8x128xf32>
    %2 = tpu.matmul %0, %1, %cst {dimension_numbers = #tpu.dot_dimension_numbers<[1], [0], [0], [1], [0, 0, 1, 1], [], []>} : vector<8x32xf32>, vector<32x128xf32>, vector<8x128xf32> -> vector<8x128xf32>
    %c0_3 = arith.constant 0 : index
    %c0_4 = arith.constant 0 : index
    %3 = vector.load %arg3[%c0_3, %c0_4] : memref<1x128xf32, #tpu.memory_space<vmem>>, vector<1x128xf32>
    %4 = vector.broadcast %3 : vector<1x128xf32> to vector<8x128xf32>
    %5 = arith.addf %2, %4 : vector<8x128xf32>
    %cst_5 = arith.constant 0.000000e+00 : f32
    %6 = vector.broadcast %cst_5 : f32 to vector<8x128xf32>
    %7 = arith.maximumf %5, %6 : vector<8x128xf32>
    %c0_6 = arith.constant 0 : index
    %c0_7 = arith.constant 0 : index
    %8 = vector.load %arg4[%c0_6, %c0_7] : memref<128x128xf32, #tpu.memory_space<vmem>>, vector<128x128xf32>
    %cst_8 = arith.constant dense<0.000000e+00> : vector<8x128xf32>
    %9 = tpu.matmul %7, %8, %cst_8 {dimension_numbers = #tpu.dot_dimension_numbers<[1], [0], [0], [1], [0, 0, 1, 1], [], []>} : vector<8x128xf32>, vector<128x128xf32>, vector<8x128xf32> -> vector<8x128xf32>
    %c0_9 = arith.constant 0 : index
    %c0_10 = arith.constant 0 : index
    %10 = vector.load %arg5[%c0_9, %c0_10] : memref<1x128xf32, #tpu.memory_space<vmem>>, vector<1x128xf32>
    %11 = vector.broadcast %10 : vector<1x128xf32> to vector<8x128xf32>
    %12 = arith.addf %9, %11 : vector<8x128xf32>
    %cst_11 = arith.constant 0.000000e+00 : f32
    %13 = vector.broadcast %cst_11 : f32 to vector<8x128xf32>
    %14 = arith.maximumf %12, %13 : vector<8x128xf32>
    %c0_12 = arith.constant 0 : index
    %c0_13 = arith.constant 0 : index
    %15 = vector.load %arg6[%c0_12, %c0_13] : memref<128x8xf32, #tpu.memory_space<vmem>>, vector<128x8xf32>
    %cst_14 = arith.constant dense<0.000000e+00> : vector<8x8xf32>
    %16 = tpu.matmul %14, %15, %cst_14 {dimension_numbers = #tpu.dot_dimension_numbers<[1], [0], [0], [1], [0, 0, 1, 1], [], []>} : vector<8x128xf32>, vector<128x8xf32>, vector<8x8xf32> -> vector<8x8xf32>
    %c0_15 = arith.constant 0 : index
    %c0_16 = arith.constant 0 : index
    %17 = vector.load %arg7[%c0_15, %c0_16] : memref<1x8xf32, #tpu.memory_space<vmem>>, vector<1x8xf32>
    %18 = vector.broadcast %17 : vector<1x8xf32> to vector<8x8xf32>
    %19 = arith.addf %16, %18 : vector<8x8xf32>
    %cst_17 = arith.constant dense<0xFF800000> : vector<8xf32>
    %20 = vector.multi_reduction <maximumf>, %19, %cst_17 [1] : vector<8x8xf32> to vector<8xf32>
    %21 = vector.shape_cast %20 : vector<8xf32> to vector<8x1xf32>
    %22 = vector.broadcast %21 : vector<8x1xf32> to vector<8x8xf32>
    %23 = arith.subf %19, %22 : vector<8x8xf32>
    %24 = math.exp %23 : vector<8x8xf32>
    %cst_18 = arith.constant dense<0.000000e+00> : vector<8xf32>
    %25 = vector.multi_reduction <add>, %24, %cst_18 [1] : vector<8x8xf32> to vector<8xf32>
    %26 = vector.shape_cast %25 : vector<8xf32> to vector<8x1xf32>
    %27 = tpu.reciprocal %26 {approx = true} : vector<8x1xf32> -> vector<8x1xf32>
    %28 = arith.mulf %26, %27 : vector<8x1xf32>
    %cst_19 = arith.constant 2.000000e+00 : f32
    %29 = vector.broadcast %cst_19 : f32 to vector<8x1xf32>
    %30 = arith.subf %29, %28 : vector<8x1xf32>
    %31 = arith.mulf %27, %30 : vector<8x1xf32>
    %32 = vector.broadcast %31 : vector<8x1xf32> to vector<8x8xf32>
    %33 = arith.mulf %24, %32 : vector<8x8xf32>
    %c0_20 = arith.constant 0 : index
    %c0_21 = arith.constant 0 : index
    %34 = vector.load %arg8[%c0_20, %c0_21] : memref<8x8xf32, #tpu.memory_space<vmem>>, vector<8x8xf32>
    tpu.vector_store %arg8[%c0_20, %c0_21], %33 {strides = array<i32>} : memref<8x8xf32, #tpu.memory_space<vmem>>, vector<8x8xf32>,
    return
  }
  func.func @transform_0(%arg0: i32) -> (i32, i32) {
    %c0_i32 = arith.constant 0 : i32
    %c0_i32_0 = arith.constant 0 : i32
    return %arg0, %c0_i32 : i32, i32
  }
  func.func @transform_1(%arg0: i32) -> (i32, i32) {
    %c0_i32 = arith.constant 0 : i32
    %c0_i32_0 = arith.constant 0 : i32
    %c0_i32_1 = arith.constant 0 : i32
    return %c0_i32, %c0_i32_0 : i32, i32
  }
  func.func @transform_2(%arg0: i32) -> (i32, i32) {
    %c0_i32 = arith.constant 0 : i32
    %c0_i32_0 = arith.constant 0 : i32
    %c0_i32_1 = arith.constant 0 : i32
    return %c0_i32, %c0_i32_0 : i32, i32
  }
  func.func @transform_3(%arg0: i32) -> (i32, i32) {
    %c0_i32 = arith.constant 0 : i32
    %c0_i32_0 = arith.constant 0 : i32
    %c0_i32_1 = arith.constant 0 : i32
    return %c0_i32, %c0_i32_0 : i32, i32
  }
  func.func @transform_4(%arg0: i32) -> (i32, i32) {
    %c0_i32 = arith.constant 0 : i32
    %c0_i32_0 = arith.constant 0 : i32
    %c0_i32_1 = arith.constant 0 : i32
    return %c0_i32, %c0_i32_0 : i32, i32
  }
  func.func @transform_5(%arg0: i32) -> (i32, i32) {
    %c0_i32 = arith.constant 0 : i32
    %c0_i32_0 = arith.constant 0 : i32
    %c0_i32_1 = arith.constant 0 : i32
    return %c0_i32, %c0_i32_0 : i32, i32
  }
  func.func @transform_6(%arg0: i32) -> (i32, i32) {
    %c0_i32 = arith.constant 0 : i32
    %c0_i32_0 = arith.constant 0 : i32
    %c0_i32_1 = arith.constant 0 : i32
    return %c0_i32, %c0_i32_0 : i32, i32
  }
  func.func @transform_7(%arg0: i32) -> (i32, i32) {
    %c0_i32 = arith.constant 0 : i32
    %c0_i32_0 = arith.constant 0 : i32
    return %arg0, %c0_i32 : i32, i32
  }
}

</mosaic_0001>

<bundles_post_ra>
// kernel: tpu_custom_call.1
= control target key start
LH: loop header
LB: loop body
LE: loop exit
PB: predicated region body
PF: predicated region fallthrough
CT: control target
= control target key end

     0   :  { %12 = vsyncpa [#allocation3], 0  ;;  %s786_s0 = inlined_call_operand.vmem [shape: f32[8,32], index: 0, kind: input, shape index: {}]   ;;  %s787_s1 = inlined_call_operand.hbm [shape: f32[32,128], index: 1, kind: input, shape index: {}]   ;;  %s788_s2 = inlined_call_operand.vmem [shape: f32[1,128], index: 2, kind: input, shape index: {}]   ;;  %s789_s3 = inlined_call_operand.vmem [shape: f32[128,128], index: 3, kind: input, shape index: {}]   ;;  %s790_s4 = inlined_call_operand.vmem [shape: f32[1,128], index: 4, kind: input, shape index: {}]   ;;  %s791_s5 = inlined_call_operand.vmem [shape: f32[128,8], index: 5, kind: input, shape index: {}]   ;;  %s792_s6 = inlined_call_operand.vmem [shape: f32[1,8], index: 6, kind: input, shape index: {}]   ;;  %s793_s7 = inlined_call_operand.hbm [shape: f32[8,8], index: 7, kind: output, shape index: {}]  }
   0x1   :  { %13 = vsyncpa [#allocation4], 0  ;;  %s583_s24 = smov [#allocation2]   ;;  %s535_s28 = scalar_lea.hbm %s787_s1, 512 }
   0x2   :  { %s21_s25 = sshll.u32 %s583_s24, 4  ;;  %p536_p0 = scmp.ne.s32.totalorder %s787_s1, %s535_s28  ;;  %s22_s25 = int_to_ptr.vmem [resolvable:$true] %s21_s25 }
   0x3   :  { %p539_p1 = scmp.lt.u32.totalorder %s535_s28, %s787_s1 }
   0x5   :  { %p541_p2 = pnand %p539_p1, %p536_p0 }
   0x7   :  { %544 = shalt.err (!%p541_p2)
}
   0x8   :  { %s545_s10 = scalar_lea.vmem %s22_s25, 512  ;;  %p550_p4 = scmp.lt.s32.totalorder %s22_s25, %s22_s25 }
   0x9   :  { %p546_p3 = scmp.ne.s32.totalorder %s22_s25, %s545_s10  ;;  %p551_p5 = scmp.lt.s32.totalorder %s545_s10, %s545_s10 }
   0xb   :  { %p552_p6 = por %p551_p5, %p550_p4 }
   0xd   :  { %p553_p7 = pnand %p552_p6, %p546_p3 }
   0xf   :  { %556 = shalt.err (!%p553_p7)
}
  0x10   :  { %s584_s11 = smov 128   ;;  %s585_s12 = smov 8  }
  0x11   :  { %27 = dma.hbm_to_vmem [thread:$0]  %s787_s1, 512, %s22_s25, [#allocation3], %s584_s11, %s584_s11, %s585_s12  }
  0x12   :  { %579 = dma.done.wait [#allocation3], 512  }
  0x13   :  { %580 = vsyncadd [#allocation3], 4294966784  ;;  %v586_v0 = vmov 0.0|0.0   ;;  %vm587_vm0 = vmmov 0   ;;  %v588_v1 = vmov 0.0   ;;  %v42_v2 = vld [vmem:[#allocation2] sm:$0xff] }
  0x14   :  { %470 = vmatprep.subr.bf16.mxu0 %v586_v0  ;;  %397 = vmatprep.mubr.msk.f32.mxu0 %vm587_vm0, %v588_v1  ;;  %v43_v3 = vld [vmem:[#allocation2 + $0x8] sm:$0xff]  ;;  %v44_v4 = vld [vmem:[#allocation2 + $0x10] sm:$0xff]  ;;  %v45_v6 = vld [vmem:[#allocation2 + $0x18] sm:$0xff]  ;;  %vm53_vm1 = vcmask 261120   ;;  %vm315_vm2 = vcmask 64512  }
  0x15   :  { %476 = vmatprep.subr.bf16.mxu1 %v586_v0  ;;  %432 = vmatprep.mubr.msk.f32.mxu1 %vm587_vm0, %v588_v1  ;;  %v471_v5 = vpack.c.bf16 %v43_v3, %v42_v2  ;;  %v128_v7 = vld [vmem:[%s789_s3] sm:$0xff]  ;;  %v129_v8 = vld [vmem:[%s789_s3 + $0x8] sm:$0xff]  ;;  %v130_v9 = vld [vmem:[%s789_s3 + $0x10] sm:$0xff]  ;;  %v474_v11 = vpack.c.bf16 %v45_v6, %v44_v4 }
  0x16   :  { %v131_v10 = vld [vmem:[%s789_s3 + $0x18] sm:$0xff]  ;;  %v477_v12 = vpack.c.bf16 %v129_v8, %v128_v7  ;;  %v132_v14 = vld [vmem:[%s789_s3 + $0x20] sm:$0xff]  ;;  %v133_v15 = vld [vmem:[%s789_s3 + $0x28] sm:$0xff] }
  0x17   :  { %472 = vmatpush3.bf16.msra.mxu0 %v471_v5  ;;  %v480_v13 = vpack.c.bf16 %v131_v10, %v130_v9  ;;  %v41_v16 = vld [vmem:[%s786_s0] sm:$0xff]  ;;  %v483_v17 = vpack.c.bf16 %v133_v15, %v132_v14  ;;  %v134_v18 = vld [vmem:[%s789_s3 + $0x30] sm:$0xff]  ;;  %v135_v19 = vld [vmem:[%s789_s3 + $0x38] sm:$0xff] }
  0x18   :  { %473 = vmatprep.subr.bf16.mxu0 %v586_v0  ;;  %478 = vmatpush3.bf16.msra.mxu1 %v477_v12  ;;  %v486_v20 = vpack.c.bf16 %v135_v19, %v134_v18  ;;  %v136_v21 = vld [vmem:[%s789_s3 + $0x40] sm:$0xff]  ;;  %v137_v22 = vld [vmem:[%s789_s3 + $0x48] sm:$0xff]  ;;  %v138_v24 = vld [vmem:[%s789_s3 + $0x50] sm:$0xff] }
  0x19   :  { %479 = vmatprep.subr.bf16.mxu1 %v586_v0  ;;  %v489_v23 = vpack.c.bf16 %v137_v22, %v136_v21  ;;  %v139_v25 = vld [vmem:[%s789_s3 + $0x58] sm:$0xff]  ;;  %v140_v27 = vld [vmem:[%s789_s3 + $0x60] sm:$0xff]  ;;  %v141_v28 = vld [vmem:[%s789_s3 + $0x68] sm:$0xff] }
  0x1a   :  { %v492_v26 = vpack.c.bf16 %v139_v25, %v138_v24  ;;  %v495_v29 = vpack.c.bf16 %v141_v28, %v140_v27  ;;  %v142_v30 = vld [vmem:[%s789_s3 + $0x70] sm:$0xff]  ;;  %v143_v31 = vld [vmem:[%s789_s3 + $0x78] sm:$0xff]  ;;  %v222_v33 = vld [vmem:[%s791_s5] sm:$0xff] }
  0x1b   :  { %475 = vmatpush3.bf16.msra.mxu0 %v474_v11  ;;  %v498_v32 = vpack.c.bf16 %v143_v31, %v142_v30  ;;  %v223_v34 = vld [vmem:[%s791_s5 + $0x8] sm:$0xff]  ;;  %v224_v35 = vld [vmem:[%s791_s5 + $0x10] sm:$0xff]  ;;  %v225_v37 = vld [vmem:[%s791_s5 + $0x18] sm:$0xff] }
  0x1c   :  { %500 = vmatprep.subr.bf16.mxu0 %v586_v0  ;;  %481 = vmatpush3.bf16.msra.mxu1 %v480_v13  ;;  %v501_v36 = vpack.c.bf16 %v223_v34, %v222_v33  ;;  %v504_v38 = vpack.c.bf16 %v225_v37, %v224_v35  ;;  %v226_v39 = vld [vmem:[%s791_s5 + $0x20] sm:$0xff]  ;;  %v227_v40 = vld [vmem:[%s791_s5 + $0x28] sm:$0xff]  ;;  %v228_v42 = vld [vmem:[%s791_s5 + $0x30] sm:$0xff] }
  0x1d   :  { %482 = vmatprep.subr.bf16.mxu1 %v586_v0  ;;  %v507_v41 = vpack.c.bf16 %v227_v40, %v226_v39  ;;  %v229_v43 = vld [vmem:[%s791_s5 + $0x38] sm:$0xff]  ;;  %v230_v45 = vld [vmem:[%s791_s5 + $0x40] sm:$0xff]  ;;  %v231_v46 = vld [vmem:[%s791_s5 + $0x48] sm:$0xff] }
  0x1e   :  { %398 = vmatmul.mubr.msk.f32.vlgmr.msra.gmra.mrb[0].mxu0 %vm53_vm1, %v41_v16  ;;  %v510_v44 = vpack.c.bf16 %v229_v43, %v228_v42  ;;  %v513_v47 = vpack.c.bf16 %v231_v46, %v230_v45  ;;  %v232_v48 = vld [vmem:[%s791_s5 + $0x50] sm:$0xff]  ;;  %v233_v49 = vld [vmem:[%s791_s5 + $0x58] sm:$0xff]  ;;  %v234_v51 = vld [vmem:[%s791_s5 + $0x60] sm:$0xff] }
  0x1f   :  { %467 = vmatprep.mubr.msk.f32.mxu0 %vm587_vm0, %v588_v1  ;;  %502 = vmatpush3.bf16.msra.mxu0 %v501_v36  ;;  %v516_v50 = vpack.c.bf16 %v233_v49, %v232_v48  ;;  %v235_v52 = vld [vmem:[%s791_s5 + $0x68] sm:$0xff]  ;;  %v346_v54 = vld [vmem:[%s788_s2] ss:$0 sm:$0xff]  ;;  %v236_v59 = vld [vmem:[%s791_s5 + $0x70] sm:$0xff] }
  0x20   :  { %484 = vmatpush3.bf16.msra.mxu1 %v483_v17  ;;  %503 = vmatprep.subr.bf16.mxu0 %v586_v0  ;;  %v519_v53 = vpack.c.bf16 %v235_v52, %v234_v51  ;;  %v237_v60 = vld [vmem:[%s791_s5 + $0x78] sm:$0xff]  ;;  %v348_v62 = vld [vmem:[%s790_s4] ss:$0 sm:$0xff]  ;;  %s589_s4 = smov [#allocation5]  }
  0x21   :  { %485 = vmatprep.subr.bf16.mxu1 %v586_v0  ;;  %v522_v61 = vpack.c.bf16 %v237_v60, %v236_v59  ;;  %v349_v3 = vld [vmem:[%s792_s6] ss:$0 sm:$0xff]  ;;  %s337_s5 = sshll.u32 %s589_s4, 4  ;;  %s338_s5 = int_to_ptr.vmem [resolvable:$true] %s337_s5 }
  0x22   :  { %s557_s6 = scalar_lea.vmem %s338_s5, 128  ;;  %p562_p9 = scmp.lt.s32.totalorder %s338_s5, %s338_s5 }
  0x23   :  { %505 = vmatpush3.bf16.msra.mxu0 %v504_v38  ;;  %p558_p8 = scmp.ne.s32.totalorder %s338_s5, %s557_s6  ;;  %p563_p10 = scmp.lt.s32.totalorder %s557_s6, %s557_s6 }
  0x24   :  { %487 = vmatpush3.bf16.msra.mxu1 %v486_v20  ;;  %506 = vmatprep.subr.bf16.mxu0 %v586_v0 }
  0x25   :  { %488 = vmatprep.subr.bf16.mxu1 %v586_v0  ;;  %p564_p11 = por %p563_p10, %p562_p9 }
  0x27   :  { %508 = vmatpush3.bf16.msra.mxu0 %v507_v41  ;;  %p565_p12 = pnand %p564_p11, %p558_p8 }
  0x28   :  { %490 = vmatpush3.bf16.msra.mxu1 %v489_v23  ;;  %509 = vmatprep.subr.bf16.mxu0 %v586_v0 }
  0x29   :  { %491 = vmatprep.subr.bf16.mxu1 %v586_v0 }
  0x2b   :  { %511 = vmatpush3.bf16.msra.mxu0 %v510_v44 }
  0x2c   :  { %493 = vmatpush3.bf16.msra.mxu1 %v492_v26  ;;  %512 = vmatprep.subr.bf16.mxu0 %v586_v0 }
  0x2d   :  { %494 = vmatprep.subr.bf16.mxu1 %v586_v0 }
  0x2f   :  { %514 = vmatpush3.bf16.msra.mxu0 %v513_v47 }
  0x30   :  { %496 = vmatpush3.bf16.msra.mxu1 %v495_v29  ;;  %515 = vmatprep.subr.bf16.mxu0 %v586_v0 }
  0x31   :  { %497 = vmatprep.subr.bf16.mxu1 %v586_v0 }
  0x33   :  { %517 = vmatpush3.bf16.msra.mxu0 %v516_v50 }
  0x34   :  { %499 = vmatpush3.bf16.msra.mxu1 %v498_v32  ;;  %518 = vmatprep.subr.bf16.mxu0 %v586_v0 }
  0x37   :  { %520 = vmatpush3.bf16.msra.mxu0 %v519_v53 }
  0x38   :  { %521 = vmatprep.subr.bf16.mxu0 %v586_v0 }
  0x3b   :  { %523 = vmatpush3.bf16.msra.mxu0 %v522_v61 }
  0xf1   :  { %v123_v55 = vpop.f32.mrb[0].mxu0 }
  0xf2   :  { %v124_v56 = vadd.f32 %v346_v54, %v123_v55  ;;  %v399_v57 = vpop.f32.mrb[1].mxu0 }
  0xf4   :  { %v127_v58 = vmax.f32 %v124_v56, 0.0 }
  0xf6   :  { %433 = vmatmul.mubr.f32.vlgmr.msra.gmra.mrb[0].mxu1 %v127_v58 }
 0x1c9   :  { %v217_v63 = vpop.f32.mrb[0].mxu1 }
 0x1ca   :  { %v218_v0 = vadd.f32 %v348_v62, %v217_v63  ;;  %v434_v1 = vpop.f32.mrb[1].mxu1 }
 0x1cc   :  { %v221_v2 = vmax.f32 %v218_v0, 0.0 }
 0x1ce   :  { %468 = vmatmul.mubr.f32.vlgmr.msra.gmra.mrb[2].mxu0 %v221_v2 }
 0x2a1   :  { %v311_v4 = vpop.f32.mrb[2].mxu0 }
 0x2a2   :  { %v312_v5 = vadd.f32 %v349_v3, %v311_v4  ;;  %v469_v6 = vpop.f32.mrb[3].mxu0 }
 0x2a4   :  { %v316_v7 = vsel %vm315_vm2, %v312_v5, -inf }
 0x2a5   :  { %317 = vmax.xlane.f32.xlu0 %v316_v7 }
 0x332   :  { %v318_v8 = vpop.xlane.xlu0 %317 }
 0x333   :  { %v319_v9 = vsub.f32 %v312_v5, %v318_v8 }
 0x335   :  { %v320_v10 = vmul.f32 1.442695, %v319_v9 }
 0x337   :  { %531 = vpow2.f32 %v320_v10 }
 0x341   :  { %v532_v11 = vpop.eup %531 }
 0x342   :  { %v322_v12 = vsel %vm315_vm2, %v532_v11, 0.0 }
 0x343   :  { %323 = vadd.xlane.f32.xlu0 %v322_v12 }
 0x3d0   :  { %v324_v13 = vpop.xlane.xlu0 %323 }
 0x3d1   :  { %533 = vrcp.f32 %v324_v13 }
 0x3db   :  { %v534_v14 = vpop.eup %533 }
 0x3dc   :  { %v326_v15 = vmul.f32 %v534_v14, %v324_v13 }
 0x3de   :  { %v327_v16 = vsub.f32 2.0, %v326_v15 }
 0x3e0   :  { %v328_v17 = vmul.f32 %v534_v14, %v327_v16 }
 0x3e2   :  { %v329_v18 = vmul.f32 %v532_v11, %v328_v17 }
 0x3e4   :  { %330 = vst.msk [vmem:[#allocation5] sm:$0xff] %vm315_vm2, %v329_v18 }
 0x3e5   :  { %568 = shalt.err (!%p565_p12)
}
 0x3e6   :  { %s569_s11 = scalar_lea.hbm %s793_s7, 128 }
 0x3e7   :  { %p570_p13 = scmp.ne.s32.totalorder %s793_s7, %s569_s11  ;;  %p573_p0 = scmp.lt.u32.totalorder %s569_s11, %s793_s7 }
 0x3e9   :  { %p575_p1 = pnand %p573_p0, %p570_p13 }
 0x3eb   :  { %578 = shalt.err (!%p575_p1)
}
 0x3ec   :  { %340 = dma.vmem_to_hbm [thread:$0]  %s338_s5, 128, %s793_s7, [#allocation4]  }
 0x3ed   :  { %581 = dma.done.wait [#allocation4], 128  }
 0x3ee   :  { %582 = vsyncadd [#allocation4], 4294967168 }
 0x3ef   :  { %344 = vsyncpa [#allocation3], 1 }
 0x3f0   :  { %345 = vsyncpa [#allocation4], 1 }

</bundles_post_ra>
